<compile_context>
chip_gen: v5e
topology: v5e:2x2
jax: 0.10.0
libtpu: 0.0.40
codegen_flags: <defaults>
</compile_context>

<pallas_src>
import functools

import jax
import jax.numpy as jnp
from jax import lax
from jax.experimental import pallas as pl
from jax.experimental.pallas import tpu as pltpu

LANES = 128
SUBLANES = 8
VREG_ELEMS = SUBLANES * LANES            # 1024: kernel-prefix granularity
MAX_TILE_ROWS = 8192                     # 8192x128 f32 = 4 MiB per input tile
CHUNK_ROWS = 64                          # rows streamed through vregs per inner step
VMEM_LIMIT = 32 * 1024 * 1024            # safe on v5e/v6e (128 MiB) and v7x (64 MiB)


def _num_tensorcores() -> int:
    """Best-effort TensorCore count (2 on v7x, 1 on v5e/v6e). Defaults to 1."""
    try:
        info = pltpu.get_tpu_info()
        for attr in ("num_cores", "core_count", "num_tensorcores",
                     "tensorcore_count", "cores_per_chip"):
            v = getattr(info, attr, None)
            if isinstance(v, int) and v > 0:
                return v
    except Exception:
        pass
    try:
        v = getattr(jax.devices()[0], "num_cores", None)
        if isinstance(v, int) and v > 0:
            return v
    except Exception:
        pass
    return 1


def _huber_jnp(x, t, delta):
    x = x.astype(jnp.float32)
    t = t.astype(jnp.float32)
    ab = jnp.abs(x - t)
    d = delta * jnp.max(ab)
    m = jnp.minimum(ab, d)
    return jnp.mean(m * (ab - 0.5 * m))


@functools.partial(jax.jit, static_argnames=("delta",))
def huber_loss(inp, target, delta: float = 0.1):
    assert inp.shape == target.shape
    flat_x = inp.reshape(-1)
    flat_t = target.reshape(-1)
    n = flat_x.shape[0]

    # Kernel consumes the largest 1024-element-aligned prefix (=> rows % 8 == 0,
    # so every tile folds cleanly into (8,128) vregs); the <1024-element tail is
    # a couple of tiny jnp ops.  For aligned sizes (common NCHW maps) the prefix
    # is the whole array and the reshape below is free (no HBM copy).
    n_main = (n // VREG_ELEMS) * VREG_ELEMS
    n_tail = n - n_main
    if n_main == 0:                       # tiny input: not worth a kernel launch
        return _huber_jnp(flat_x, flat_t, delta)

    rows = n_main // LANES                # multiple of 8
    x2d = (flat_x if n_tail == 0 else flat_x[:n_main]).reshape(rows, LANES)
    t2d = (flat_t if n_tail == 0 else flat_t[:n_main]).reshape(rows, LANES)

    # ---- grid / tiling (all static) ----------------------------------------
    tile_rows = min(MAX_TILE_ROWS, rows)             # multiple of 8
    total_steps = pl.cdiv(rows, tile_rows)
    num_cores = _num_tensorcores()
    split = 2 if (num_cores >= 2 and total_steps >= 2) else 1
    steps_per_split = pl.cdiv(total_steps, split)
    needs_step_guard = steps_per_split * split != total_steps
    needs_row_mask = rows % tile_rows != 0           # ragged last grid step

    chunk_rows = min(CHUNK_ROWS, tile_rows)          # multiple of 8
    num_chunks = tile_rows // chunk_rows
    rem_rows = tile_rows - num_chunks * chunk_rows   # multiple of 8

    num_max_entries = split + (1 if n_tail else 0)

    def data_index_map(s, j):
        idx = s * steps_per_split + j
        if needs_step_guard:
            idx = jnp.minimum(idx, total_steps - 1)  # keep DMA windows in bounds
        return (idx, 0)

    tile_spec = pl.BlockSpec((tile_rows, LANES), data_index_map)
    scalar_out_spec = pl.BlockSpec(
        (1, 1), lambda s, j: (s, 0), memory_space=pltpu.MemorySpace.SMEM)
    maxes_spec = pl.BlockSpec(
        (num_max_entries, 1), lambda s, j: (0, 0),
        memory_space=pltpu.MemorySpace.SMEM)

    # ---- shared in-kernel helpers -------------------------------------------
    def _tile_reduce(x_ref, t_ref, acc0, gstep, masked, make_vals, fold, combine):
        """Stream this grid step's (tile_rows,128) block through vregs in
        chunk_rows slices; fold each slice to (8,128) and combine into acc0.
        The accumulator never round-trips through VMEM inside the loop."""
        row_base = gstep * tile_rows

        def one_chunk(start, nrows, acc):
            xs = x_ref[pl.ds(start, nrows), :].astype(jnp.float32)
            ts = t_ref[pl.ds(start, nrows), :].astype(jnp.float32)
            vals = make_vals(xs, ts)
            if masked:
                # Zero rows past the logical end of the slab (OOB block rows).
                ridx = (row_base + start
                        + lax.broadcasted_iota(jnp.int32, (nrows, LANES), 0))
                vals = jnp.where(ridx < rows, vals, 0.0)
            folded = fold(vals.reshape(nrows // SUBLANES, SUBLANES, LANES))
            return combine(acc, folded)

        if num_chunks == 1:
            acc = one_chunk(0, chunk_rows, acc0)
        else:
            def body(c, acc):
                start = pl.multiple_of(c * chunk_rows, chunk_rows)
                return one_chunk(start, chunk_rows, acc)
            acc = lax.fori_loop(0, num_chunks, body, acc0, unroll=2)
        if rem_rows:
            acc = one_chunk(num_chunks * chunk_rows, rem_rows, acc)
        return acc

    def _dispatch(gstep, run):
        """Invoke the accumulate step; mask only on the last real grid step."""
        last_real = gstep == total_steps - 1
        in_bounds = (gstep < total_steps) if needs_step_guard else None
        if needs_row_mask:
            masked_cond = last_real
            fast_cond = jnp.logical_not(last_real)
            if in_bounds is not None:
                masked_cond = jnp.logical_and(in_bounds, masked_cond)
                fast_cond = jnp.logical_and(in_bounds, fast_cond)
            pl.when(masked_cond)(run(True))
            pl.when(fast_cond)(run(False))
        elif in_bounds is not None:
            pl.when(in_bounds)(run(False))
        else:
            run(False)()

    # ---- pass 1: global max of |input - target| -----------------------------
    def absmax_kernel(x_ref, t_ref, out_ref, acc_ref):
        s, j = pl.program_id(0), pl.program_id(1)
        gstep = s * steps_per_split + j

        @pl.when(j == 0)
        def _():
            # abserr >= 0, so 0 is a valid identity element for this max.
            acc_ref[...] = jnp.zeros_like(acc_ref)

        def run(masked):
            def _go():
                acc_ref[...] = _tile_reduce(
                    x_ref, t_ref, acc_ref[...], gstep, masked,
                    make_vals=lambda xs, ts: jnp.abs(xs - ts),
                    fold=lambda v: jnp.max(v, axis=0),
                    combine=jnp.maximum)
            return _go

        _dispatch(gstep, run)

        @pl.when(j == steps_per_split - 1)
        def _():
            out_ref[0, 0] = jnp.max(acc_ref[...])

    # ---- pass 2: sum of elementwise huber losses ----------------------------
    def loss_sum_kernel(maxes_ref, x_ref, t_ref, out_ref, acc_ref):
        s, j = pl.program_id(0), pl.program_id(1)
        gstep = s * steps_per_split + j

        # delta = coef * global max(|err|), rebuilt from SMEM partials so no
        # tiny host-side XLA op sits between the two pallas_call launches.
        gmax = maxes_ref[0, 0]
        for idx in range(1, num_max_entries):
            gmax = jnp.maximum(gmax, maxes_ref[idx, 0])
        d = jnp.float32(delta) * gmax

        @pl.when(j == 0)
        def _():
            acc_ref[...] = jnp.zeros_like(acc_ref)

        def huber_vals(xs, ts):
            ab = jnp.abs(xs - ts)
            m = jnp.minimum(ab, d)        # branchless huber (== torch.where form)
            return m * (ab - 0.5 * m)

        def run(masked):
            def _go():
                acc_ref[...] = _tile_reduce(
                    x_ref, t_ref, acc_ref[...], gstep, masked,
                    make_vals=huber_vals,
                    fold=lambda v: jnp.sum(v, axis=0),
                    combine=lambda a, b: a + b)
            return _go

        _dispatch(gstep, run)

        @pl.when(j == steps_per_split - 1)
        def _():
            out_ref[0, 0] = jnp.sum(acc_ref[...])

    # ---- launches ------------------------------------------------------------
    grid = (split, steps_per_split)
    cparams = pltpu.CompilerParams(
        dimension_semantics=("parallel", "arbitrary"),
        vmem_limit_bytes=VMEM_LIMIT)
    acc_scratch = [pltpu.VMEM((SUBLANES, LANES), jnp.float32)]

    partial_max = pl.pallas_call(
        absmax_kernel,
        out_shape=jax.ShapeDtypeStruct((split, 1), jnp.float32),
        grid_spec=pltpu.PrefetchScalarGridSpec(
            num_scalar_prefetch=0, grid=grid,
            in_specs=[tile_spec, tile_spec],
            out_specs=scalar_out_spec,
            scratch_shapes=acc_scratch),
        compiler_params=cparams,
    )(x2d, t2d)

    if n_tail:
        tail_x = flat_x[n_main:].astype(jnp.float32)
        tail_t = flat_t[n_main:].astype(jnp.float32)
        tail_abs = jnp.abs(tail_x - tail_t)
        tail_max = jnp.max(tail_abs).reshape(1, 1)
        maxes = jnp.concatenate([partial_max, tail_max], axis=0)
    else:
        maxes = partial_max

    partial_sum = pl.pallas_call(
        loss_sum_kernel,
        out_shape=jax.ShapeDtypeStruct((split, 1), jnp.float32),
        grid_spec=pltpu.PrefetchScalarGridSpec(
            num_scalar_prefetch=0, grid=grid,
            in_specs=[maxes_spec, tile_spec, tile_spec],
            out_specs=scalar_out_spec,
            scratch_shapes=acc_scratch),
        compiler_params=cparams,
    )(maxes, x2d, t2d)

    total = jnp.sum(partial_sum)
    if n_tail:
        d = jnp.float32(delta) * jnp.max(maxes)
        m = jnp.minimum(tail_abs, d)
        total = total + jnp.sum(m * (tail_abs - 0.5 * m))
    return total / jnp.float32(n)


def huber_ref(inp, target, delta: float = 0.1):
    inp = inp.astype(jnp.float32)
    target = target.astype(jnp.float32)
    err = inp - target
    abserr = jnp.abs(err)
    d = delta * jnp.max(abserr)
    losses = jnp.where(abserr <= d, 0.5 * err ** 2, d * abserr - 0.5 * d ** 2)
    return jnp.mean(losses)


if __name__ == "__main__":
    key = jax.random.PRNGKey(0)
    k1, k2 = jax.random.split(key)
    # Typical regression-loss inputs (e.g. depth prediction maps), NCHW.
    shape = (2, 4, 16, 16)
    x = jax.random.normal(k1, shape, dtype=jnp.float32)
    y = jax.random.normal(k2, shape, dtype=jnp.float32)

    out = huber_loss(x, y, delta=0.1)
    jax.block_until_ready(out)

    ref = huber_ref(x, y, delta=0.1)
    assert jnp.allclose(out, ref, rtol=1e-5, atol=1e-6), (out, ref)
    print("KERNEL_OK")
</pallas_src>

<mosaic_0001>
module attributes {stable_mosaic.version = 11 : i64} {
  func.func @loss_sum_kernel(%arg0: i32, %arg1: i32, %arg2: memref<1x1xf32, #tpu.memory_space<smem>>, %arg3: memref<16x128xf32, #tpu.memory_space<vmem>>, %arg4: memref<16x128xf32, #tpu.memory_space<vmem>>, %arg5: memref<1x1xf32, #tpu.memory_space<smem>>, %arg6: memref<8x128xf32, #tpu.memory_space<vmem>>) attributes {dimension_semantics = [#tpu.dimension_semantics<parallel>, #tpu.dimension_semantics<arbitrary>], iteration_bounds = array<i64: 1, 1>, scalar_prefetch = 0 : i64, scratch_operands = 1 : i64, tpu.core_type = #tpu.core_type<tc>, window_params = [{transform_indices = @transform_0, window_bounds = array<i64: 1, 1>}, {transform_indices = @transform_1, window_bounds = array<i64: 16, 128>}, {transform_indices = @transform_2, window_bounds = array<i64: 16, 128>}, {transform_indices = @transform_3, window_bounds = array<i64: 1, 1>}]} {
    %c0 = arith.constant 0 : index
    %c0_0 = arith.constant 0 : index
    %0 = memref.load %arg2[%c0, %c0_0] : memref<1x1xf32, #tpu.memory_space<smem>>
    %cst = arith.constant 1.000000e-01 : f32
    %1 = arith.mulf %cst, %0 : f32
    %c0_i32 = arith.constant 0 : i32
    %2 = arith.cmpi eq, %arg1, %c0_i32 : i32
    %3 = arith.extui %2 : i1 to i32
    %c0_i32_1 = arith.constant 0 : i32
    %4 = arith.cmpi ne, %3, %c0_i32_1 : i32
    scf.if %4 {
      %cst_14 = arith.constant 0.000000e+00 : f32
      %23 = vector.broadcast %cst_14 : f32 to vector<8x128xf32>
      %c0_15 = arith.constant 0 : index
      %c0_16 = arith.constant 0 : index
      %24 = vector.load %arg6[%c0_15, %c0_16] : memref<8x128xf32, #tpu.memory_space<vmem>>, vector<8x128xf32>
      tpu.vector_store %arg6[%c0_15, %c0_16], %23 {strides = array<i32>} : memref<8x128xf32, #tpu.memory_space<vmem>>, vector<8x128xf32>,
    } else {
    }
    %c0_2 = arith.constant 0 : index
    %c0_3 = arith.constant 0 : index
    %5 = vector.load %arg6[%c0_2, %c0_3] : memref<8x128xf32, #tpu.memory_space<vmem>>, vector<8x128xf32>
    %c0_4 = arith.constant 0 : index
    %c0_5 = arith.constant 0 : index
    %6 = vector.load %arg3[%c0_4, %c0_5] : memref<16x128xf32, #tpu.memory_space<vmem>>, vector<16x128xf32>
    %c0_6 = arith.constant 0 : index
    %c0_7 = arith.constant 0 : index
    %7 = vector.load %arg4[%c0_6, %c0_7] : memref<16x128xf32, #tpu.memory_space<vmem>>, vector<16x128xf32>
    %8 = arith.subf %6, %7 : vector<16x128xf32>
    %9 = math.absf %8 : vector<16x128xf32>
    %10 = vector.broadcast %1 : f32 to vector<16x128xf32>
    %11 = arith.minimumf %9, %10 : vector<16x128xf32>
    %cst_8 = arith.constant 5.000000e-01 : f32
    %12 = vector.broadcast %cst_8 : f32 to vector<16x128xf32>
    %13 = arith.mulf %12, %11 : vector<16x128xf32>
    %14 = arith.subf %9, %13 : vector<16x128xf32>
    %15 = arith.mulf %11, %14 : vector<16x128xf32>
    %16 = vector.shape_cast %15 : vector<16x128xf32> to vector<2x8x128xf32>
    %cst_9 = arith.constant dense<0.000000e+00> : vector<8x128xf32>
    %17 = vector.multi_reduction <add>, %16, %cst_9 [0] : vector<2x8x128xf32> to vector<8x128xf32>
    %18 = arith.addf %5, %17 : vector<8x128xf32>
    %c0_10 = arith.constant 0 : index
    %c0_11 = arith.constant 0 : index
    %19 = vector.load %arg6[%c0_10, %c0_11] : memref<8x128xf32, #tpu.memory_space<vmem>>, vector<8x128xf32>
    tpu.vector_store %arg6[%c0_10, %c0_11], %18 {strides = array<i32>} : memref<8x128xf32, #tpu.memory_space<vmem>>, vector<8x128xf32>,
    %c0_i32_12 = arith.constant 0 : i32
    %20 = arith.cmpi eq, %arg1, %c0_i32_12 : i32
    %21 = arith.extui %20 : i1 to i32
    %c0_i32_13 = arith.constant 0 : i32
    %22 = arith.cmpi ne, %21, %c0_i32_13 : i32
    scf.if %22 {
      %c0_14 = arith.constant 0 : index
      %c0_15 = arith.constant 0 : index
      %23 = vector.load %arg6[%c0_14, %c0_15] : memref<8x128xf32, #tpu.memory_space<vmem>>, vector<8x128xf32>
      %24 = vector.shape_cast %23 : vector<8x128xf32> to vector<1x8x128xf32>
      %cst_16 = arith.constant dense<0.000000e+00> : vector<1xf32>
      %25 = vector.multi_reduction <add>, %24, %cst_16 [1, 2] : vector<1x8x128xf32> to vector<1xf32>
      %26 = vector.shape_cast %25 : vector<1xf32> to vector<1x1x1xf32>
      %27 = vector.extract %26[0, 0, 0] : f32 from vector<1x1x1xf32>
      %c0_17 = arith.constant 0 : index
      %c0_18 = arith.constant 0 : index
      %28 = memref.load %arg5[%c0_17, %c0_18] : memref<1x1xf32, #tpu.memory_space<smem>>
      memref.store %27, %arg5[%c0_17, %c0_18] : memref<1x1xf32, #tpu.memory_space<smem>>
    } else {
    }
    return
  }
  func.func @transform_0(%arg0: i32, %arg1: i32) -> (i32, i32) {
    %c0_i32 = arith.constant 0 : i32
    %c0_i32_0 = arith.constant 0 : i32
    %c0_i32_1 = arith.constant 0 : i32
    return %c0_i32, %c0_i32_0 : i32, i32
  }
  func.func @transform_1(%arg0: i32, %arg1: i32) -> (i32, i32) {
    %c1_i32 = arith.constant 1 : i32
    %0 = arith.muli %arg0, %c1_i32 : i32
    %1 = arith.addi %0, %arg1 : i32
    %c0_i32 = arith.constant 0 : i32
    %c0_i32_0 = arith.constant 0 : i32
    return %1, %c0_i32 : i32, i32
  }
  func.func @transform_2(%arg0: i32, %arg1: i32) -> (i32, i32) {
    %c1_i32 = arith.constant 1 : i32
    %0 = arith.muli %arg0, %c1_i32 : i32
    %1 = arith.addi %0, %arg1 : i32
    %c0_i32 = arith.constant 0 : i32
    %c0_i32_0 = arith.constant 0 : i32
    return %1, %c0_i32 : i32, i32
  }
  func.func @transform_3(%arg0: i32, %arg1: i32) -> (i32, i32) {
    %c0_i32 = arith.constant 0 : i32
    %c0_i32_0 = arith.constant 0 : i32
    return %arg0, %c0_i32 : i32, i32
  }
}

module attributes {stable_mosaic.version = 11 : i64} {
  func.func @absmax_kernel(%arg0: i32, %arg1: i32, %arg2: memref<16x128xf32, #tpu.memory_space<vmem>>, %arg3: memref<16x128xf32, #tpu.memory_space<vmem>>, %arg4: memref<1x1xf32, #tpu.memory_space<smem>>, %arg5: memref<8x128xf32, #tpu.memory_space<vmem>>) attributes {dimension_semantics = [#tpu.dimension_semantics<parallel>, #tpu.dimension_semantics<arbitrary>], iteration_bounds = array<i64: 1, 1>, scalar_prefetch = 0 : i64, scratch_operands = 1 : i64, tpu.core_type = #tpu.core_type<tc>, window_params = [{transform_indices = @transform_0, window_bounds = array<i64: 16, 128>}, {transform_indices = @transform_1, window_bounds = array<i64: 16, 128>}, {transform_indices = @transform_2, window_bounds = array<i64: 1, 1>}]} {
    %c0_i32 = arith.constant 0 : i32
    %0 = arith.cmpi eq, %arg1, %c0_i32 : i32
    %1 = arith.extui %0 : i1 to i32
    %c0_i32_0 = arith.constant 0 : i32
    %2 = arith.cmpi ne, %1, %c0_i32_0 : i32
    scf.if %2 {
      %cst_10 = arith.constant 0.000000e+00 : f32
      %15 = vector.broadcast %cst_10 : f32 to vector<8x128xf32>
      %c0_11 = arith.constant 0 : index
      %c0_12 = arith.constant 0 : index
      %16 = vector.load %arg5[%c0_11, %c0_12] : memref<8x128xf32, #tpu.memory_space<vmem>>, vector<8x128xf32>
      tpu.vector_store %arg5[%c0_11, %c0_12], %15 {strides = array<i32>} : memref<8x128xf32, #tpu.memory_space<vmem>>, vector<8x128xf32>,
    } else {
    }
    %c0 = arith.constant 0 : index
    %c0_1 = arith.constant 0 : index
    %3 = vector.load %arg5[%c0, %c0_1] : memref<8x128xf32, #tpu.memory_space<vmem>>, vector<8x128xf32>
    %c0_2 = arith.constant 0 : index
    %c0_3 = arith.constant 0 : index
    %4 = vector.load %arg2[%c0_2, %c0_3] : memref<16x128xf32, #tpu.memory_space<vmem>>, vector<16x128xf32>
    %c0_4 = arith.constant 0 : index
    %c0_5 = arith.constant 0 : index
    %5 = vector.load %arg3[%c0_4, %c0_5] : memref<16x128xf32, #tpu.memory_space<vmem>>, vector<16x128xf32>
    %6 = arith.subf %4, %5 : vector<16x128xf32>
    %7 = math.absf %6 : vector<16x128xf32>
    %8 = vector.shape_cast %7 : vector<16x128xf32> to vector<2x8x128xf32>
    %cst = arith.constant dense<0xFF800000> : vector<8x128xf32>
    %9 = vector.multi_reduction <maximumf>, %8, %cst [0] : vector<2x8x128xf32> to vector<8x128xf32>
    %10 = arith.maximumf %3, %9 : vector<8x128xf32>
    %c0_6 = arith.constant 0 : index
    %c0_7 = arith.constant 0 : index
    %11 = vector.load %arg5[%c0_6, %c0_7] : memref<8x128xf32, #tpu.memory_space<vmem>>, vector<8x128xf32>
    tpu.vector_store %arg5[%c0_6, %c0_7], %10 {strides = array<i32>} : memref<8x128xf32, #tpu.memory_space<vmem>>, vector<8x128xf32>,
    %c0_i32_8 = arith.constant 0 : i32
    %12 = arith.cmpi eq, %arg1, %c0_i32_8 : i32
    %13 = arith.extui %12 : i1 to i32
    %c0_i32_9 = arith.constant 0 : i32
    %14 = arith.cmpi ne, %13, %c0_i32_9 : i32
    scf.if %14 {
      %c0_10 = arith.constant 0 : index
      %c0_11 = arith.constant 0 : index
      %15 = vector.load %arg5[%c0_10, %c0_11] : memref<8x128xf32, #tpu.memory_space<vmem>>, vector<8x128xf32>
      %16 = vector.shape_cast %15 : vector<8x128xf32> to vector<1x8x128xf32>
      %cst_12 = arith.constant dense<0xFF800000> : vector<1xf32>
      %17 = vector.multi_reduction <maximumf>, %16, %cst_12 [1, 2] : vector<1x8x128xf32> to vector<1xf32>
      %18 = vector.shape_cast %17 : vector<1xf32> to vector<1x1x1xf32>
      %19 = vector.extract %18[0, 0, 0] : f32 from vector<1x1x1xf32>
      %c0_13 = arith.constant 0 : index
      %c0_14 = arith.constant 0 : index
      %20 = memref.load %arg4[%c0_13, %c0_14] : memref<1x1xf32, #tpu.memory_space<smem>>
      memref.store %19, %arg4[%c0_13, %c0_14] : memref<1x1xf32, #tpu.memory_space<smem>>
    } else {
    }
    return
  }
  func.func @transform_0(%arg0: i32, %arg1: i32) -> (i32, i32) {
    %c1_i32 = arith.constant 1 : i32
    %0 = arith.muli %arg0, %c1_i32 : i32
    %1 = arith.addi %0, %arg1 : i32
    %c0_i32 = arith.constant 0 : i32
    %c0_i32_0 = arith.constant 0 : i32
    return %1, %c0_i32 : i32, i32
  }
  func.func @transform_1(%arg0: i32, %arg1: i32) -> (i32, i32) {
    %c1_i32 = arith.constant 1 : i32
    %0 = arith.muli %arg0, %c1_i32 : i32
    %1 = arith.addi %0, %arg1 : i32
    %c0_i32 = arith.constant 0 : i32
    %c0_i32_0 = arith.constant 0 : i32
    return %1, %c0_i32 : i32, i32
  }
  func.func @transform_2(%arg0: i32, %arg1: i32) -> (i32, i32) {
    %c0_i32 = arith.constant 0 : i32
    %c0_i32_0 = arith.constant 0 : i32
    return %arg0, %c0_i32 : i32, i32
  }
}

</mosaic_0001>

<bundles_post_ra>
// kernel: huber_loss.3
= control target key start
LH: loop header
LB: loop body
LE: loop exit
PB: predicated region body
PF: predicated region fallthrough
CT: control target
= control target key end

     0   :  { %s186_s0 = inlined_call_operand.<no memory space> [shape: f32[1,1], index: 0, kind: input, shape index: {}]   ;;  %s187_s1 = inlined_call_operand.vmem [shape: f32[16,128], index: 1, kind: input, shape index: {}]   ;;  %s188_s2 = inlined_call_operand.vmem [shape: f32[16,128], index: 2, kind: input, shape index: {}]   ;;  %s189_s3 = inlined_call_operand.hbm [shape: f32[1,1], index: 3, kind: output, shape index: {}]  }
   0x1   :  { %s61_s14 = smul.f32 0.1, %s186_s0  ;;  %v68_v0 = vld [vmem:[%s187_s1] sm:$0xff]  ;;  %v69_v1 = vld [vmem:[%s187_s1 + $0x8] sm:$0xff] }
   0x2   :  { %v70_v2 = vld [vmem:[%s188_s2] sm:$0xff]  ;;  %v71_v3 = vld [vmem:[%s188_s2 + $0x8] sm:$0xff] }
   0x3   :  { %v72_v4 = vsub.f32 %v68_v0, %v70_v2 }
   0x4   :  { %9 = vsyncpa [#allocation5], 0  ;;  %v73_v5 = vsub.f32 %v69_v1, %v71_v3  ;;  %v76_v6 = vstv %s61_s14  ;;  %s108_s2 = sshll.u32 %s189_s3, 4  ;;  %s147_s24 = smov [#allocation4]   ;;  %s109_s2 = int_to_ptr.hbm [resolvable:$true] %s108_s2 }
   0x5   :  { %v74_v7 = vand.u32 2147483647, %v72_v4 }
   0x6   :  { %v75_v8 = vand.u32 2147483647, %v73_v5 }
   0x7   :  { %v77_v9 = vmin.f32 %v74_v7, %v76_v6 }
   0x8   :  { %v78_v10 = vmin.f32 %v75_v8, %v76_v6 }
   0x9   :  { %v79_v11 = vmul.f32 0.5, %v77_v9 }
   0xa   :  { %v80_v12 = vmul.f32 0.5, %v78_v10 }
   0xb   :  { %v81_v13 = vsub.f32 %v74_v7, %v79_v11 }
   0xc   :  { %v82_v14 = vsub.f32 %v75_v8, %v80_v12 }
   0xd   :  { %v83_v15 = vmul.f32 %v81_v13, %v77_v9 }
   0xe   :  { %v84_v16 = vmul.f32 %v82_v14, %v78_v10 }
  0x10   :  { %v85_v17 = vadd.f32 %v84_v16, %v83_v15 }
  0x12   :  { %92 = vadd.xlane.f32.xlu0 %v85_v17 }
  0x85   :  { %v93_v18 = vpop.xlane.xlu0 %92 }
  0x86   :  { %v94_v19 = vrot.slane %v93_v18, 4 }
  0x88   :  { %v95_v20 = vadd.f32 %v94_v19, %v93_v18 }
  0x8a   :  { %v96_v21 = vrot.slane %v95_v20, 2 }
  0x8c   :  { %v97_v22 = vadd.f32 %v96_v21, %v95_v20 }
  0x8e   :  { %v98_v23 = vrot.slane %v97_v22, 1 }
  0x90   :  { %v99_v24 = vadd.f32 %v98_v23, %v97_v22 }
  0x92   :  { %130 = vpush %v99_v24 }
  0xc3   :  { %s131_s23 = spop %130 }
  0xc4   :  { %102 = sst [smem:[#allocation4]] %s131_s23 }
  0xc5   :  { %111 = dma.smem_to_hbm %s147_s24, 16, %s109_s2, [#allocation5]  }
  0xc6   :  { %145 = dma.done.wait [#allocation5], 16  }
  0xc7   :  { %146 = vsyncadd [#allocation5], 4294967280 }
  0xc8   :  { %116 = sfence }
  0xc9   :  { %117 = vsyncpa [#allocation5], 1 }

// kernel: huber_loss.2
= control target key start
LH: loop header
LB: loop body
LE: loop exit
PB: predicated region body
PF: predicated region fallthrough
CT: control target
= control target key end

     0   :  { %s163_s0 = inlined_call_operand.vmem [shape: f32[16,128], index: 0, kind: input, shape index: {}]   ;;  %s164_s1 = inlined_call_operand.vmem [shape: f32[16,128], index: 1, kind: input, shape index: {}]   ;;  %s165_s2 = inlined_call_operand.hbm [shape: f32[1,1], index: 2, kind: output, shape index: {}]  }
   0x1   :  { %v62_v0 = vld [vmem:[%s163_s0] sm:$0xff]  ;;  %v63_v1 = vld [vmem:[%s163_s0 + $0x8] sm:$0xff] }
   0x2   :  { %v64_v2 = vld [vmem:[%s164_s1] sm:$0xff]  ;;  %v65_v3 = vld [vmem:[%s164_s1 + $0x8] sm:$0xff] }
   0x3   :  { %v66_v4 = vsub.f32 %v62_v0, %v64_v2 }
   0x4   :  { %7 = vsyncpa [#allocation4], 0  ;;  %v67_v5 = vsub.f32 %v63_v1, %v65_v3  ;;  %s93_s1 = sshll.u32 %s165_s2, 4  ;;  %s132_s19 = smov [#allocation3]   ;;  %s94_s1 = int_to_ptr.hbm [resolvable:$true] %s93_s1 }
   0x5   :  { %v68_v6 = vand.u32 2147483647, %v66_v4 }
   0x6   :  { %v69_v7 = vand.u32 2147483647, %v67_v5 }
   0x8   :  { %v70_v8 = vmax.f32 %v68_v6, %v69_v7 }
   0xa   :  { %v71_v9 = vmax.f32 %v70_v8, 0.0 }
   0xc   :  { %77 = vmax.xlane.f32.xlu0 %v71_v9 }
  0x7f   :  { %v78_v10 = vpop.xlane.xlu0 %77 }
  0x80   :  { %v79_v11 = vrot.slane %v78_v10, 4 }
  0x82   :  { %v80_v12 = vmax.f32 %v78_v10, %v79_v11 }
  0x84   :  { %v81_v13 = vrot.slane %v80_v12, 2 }
  0x86   :  { %v82_v14 = vmax.f32 %v80_v12, %v81_v13 }
  0x88   :  { %v83_v15 = vrot.slane %v82_v14, 1 }
  0x8a   :  { %v84_v16 = vmax.f32 %v82_v14, %v83_v15 }
  0x8c   :  { %115 = vpush %v84_v16 }
  0xbd   :  { %s116_s18 = spop %115 }
  0xbe   :  { %87 = sst [smem:[#allocation3]] %s116_s18 }
  0xbf   :  { %96 = dma.smem_to_hbm %s132_s19, 16, %s94_s1, [#allocation4]  }
  0xc0   :  { %130 = dma.done.wait [#allocation4], 16  }
  0xc1   :  { %131 = vsyncadd [#allocation4], 4294967280 }
  0xc2   :  { %101 = sfence }
  0xc3   :  { %102 = vsyncpa [#allocation4], 1 }

</bundles_post_ra>
